<compile_context>
chip_gen: v7x
topology: tpu7x:2x2x1
jax: 0.10.0
libtpu: 0.0.40
codegen_flags: <defaults>
</compile_context>

<pallas_src>
import functools

import jax
import jax.numpy as jnp
from jax.experimental import pallas as pl
from jax.experimental.pallas import tpu as pltpu

LANE = 128
FAST_N_MAX = 2048  # fast-path cap on the padded node count


def _round_up(x, m):
    return ((x + m - 1) // m) * m


def _vmem_budget():
    """Generation-aware VMEM budget: capacity minus ~24 MiB headroom."""
    cap = 64 * 1024 * 1024  # conservative default (v7x per-TC capacity)
    try:
        info = pltpu.get_tpu_info()
        cap = int(getattr(info, "vmem_capacity_bytes", cap))
    except Exception:
        pass
    return max(32 * 1024 * 1024, cap - 24 * 1024 * 1024)


# ---------------------------------------------------------------------------
# Fast path: both GCN layers fused into ONE pallas_call (everything resident).
# ---------------------------------------------------------------------------

def _fused_small_kernel(x_ref, adj_ref, w1_ref, b1_ref, w2_ref, b2_ref, o_ref):
    adj = adj_ref[...]
    xw1 = jnp.dot(x_ref[...], w1_ref[...], preferred_element_type=jnp.float32)
    h1 = jnp.dot(adj, xw1.astype(jnp.bfloat16),
                 preferred_element_type=jnp.float32)
    h1 = jnp.maximum(h1 + b1_ref[...], 0.0)
    h1w2 = jnp.dot(h1.astype(jnp.bfloat16), w2_ref[...],
                   preferred_element_type=jnp.float32)
    out = jnp.dot(adj, h1w2.astype(jnp.bfloat16),
                  preferred_element_type=jnp.float32)
    o_ref[...] = out + b2_ref[...]


def _fused_small(x_p, adj_p, w1_p, b1_p, w2_p, b2_p, *, budget):
    n_pad = adj_p.shape[0]
    l_pad = w2_p.shape[1]
    return pl.pallas_call(
        _fused_small_kernel,
        out_shape=jax.ShapeDtypeStruct((n_pad, l_pad), jnp.float32),
        compiler_params=pltpu.CompilerParams(vmem_limit_bytes=budget),
    )(x_p, adj_p, w1_p, b1_p, w2_p, b2_p)


# ---------------------------------------------------------------------------
# Tiled path, stage 1: XW = X @ W  (bf16 in, f32 acc, bf16 out)
# ---------------------------------------------------------------------------

def _project_kernel(x_ref, w_ref, o_ref):
    o_ref[...] = jnp.dot(
        x_ref[...], w_ref[...], preferred_element_type=jnp.float32
    ).astype(o_ref.dtype)


def _project(x_bf16, w_bf16, *, tm, budget):
    n_pad, f_pad = x_bf16.shape
    w_out = w_bf16.shape[1]
    return pl.pallas_call(
        _project_kernel,
        out_shape=jax.ShapeDtypeStruct((n_pad, w_out), jnp.bfloat16),
        grid=(n_pad // tm,),
        in_specs=[
            pl.BlockSpec((tm, f_pad), lambda i: (i, 0)),
            pl.BlockSpec((f_pad, w_out), lambda i: (0, 0)),
        ],
        out_specs=pl.BlockSpec((tm, w_out), lambda i: (i, 0)),
        compiler_params=pltpu.CompilerParams(
            dimension_semantics=("parallel",),
            vmem_limit_bytes=budget,
        ),
    )(x_bf16, w_bf16)


# ---------------------------------------------------------------------------
# Tiled path, stage 2: aggregation  acc = adj @ dense  on an (i, k) grid.
#   Layer 1 variant fuses bias + ReLU + (@ W2) into the finalize branch and
#   emits h1w2 directly.  Layer 2 variant emits acc + b2 in f32.
# ---------------------------------------------------------------------------

def _dense_tile(dense_ref, k, tk, dense_resident):
    if dense_resident:
        start = pl.multiple_of(k * tk, tk)
        return dense_ref[pl.ds(start, tk), :]
    return dense_ref[...]


def _agg_fused_l1_kernel(adj_ref, dense_ref, b_ref, w2_ref, o_ref, acc_ref, *,
                         tk, dense_resident):
    k = pl.program_id(1)

    @pl.when(k == 0)
    def _():
        acc_ref[...] = jnp.zeros_like(acc_ref)

    acc_ref[...] += jnp.dot(
        adj_ref[...], _dense_tile(dense_ref, k, tk, dense_resident),
        preferred_element_type=jnp.float32)

    @pl.when(k == pl.num_programs(1) - 1)
    def _():
        h1 = jnp.maximum(acc_ref[...] + b_ref[...], 0.0)
        o_ref[...] = jnp.dot(
            h1.astype(jnp.bfloat16), w2_ref[...],
            preferred_element_type=jnp.float32).astype(o_ref.dtype)


def _agg_l2_kernel(adj_ref, dense_ref, b_ref, o_ref, acc_ref, *,
                   tk, dense_resident):
    k = pl.program_id(1)

    @pl.when(k == 0)
    def _():
        acc_ref[...] = jnp.zeros_like(acc_ref)

    acc_ref[...] += jnp.dot(
        adj_ref[...], _dense_tile(dense_ref, k, tk, dense_resident),
        preferred_element_type=jnp.float32)

    @pl.when(k == pl.num_programs(1) - 1)
    def _():
        o_ref[...] = (acc_ref[...] + b_ref[...]).astype(o_ref.dtype)


def _aggregate(adj_bf16, dense_bf16, b_f32, w_next, *, tm, tk, budget,
               fuse_proj, out_dtype):
    n_pad = adj_bf16.shape[0]
    w_in = dense_bf16.shape[1]
    w_out = w_next.shape[1] if fuse_proj else w_in

    # Keep the dense operand fully resident in VMEM (DMA'd once) whenever it
    # fits next to the adj double buffers, accumulator and output tiles.
    fixed = 2 * (tm * tk * 2) + tm * w_in * 4 + 2 * (tm * w_out * 2) + (4 << 20)
    dense_bytes = 2 * n_pad * w_in * 2  # x2: allow double-buffer allocation
    dense_resident = dense_bytes <= (budget - fixed)

    dense_spec = (
        pl.BlockSpec((n_pad, w_in), lambda i, k: (0, 0)) if dense_resident
        else pl.BlockSpec((tk, w_in), lambda i, k: (k, 0)))

    in_specs = [
        pl.BlockSpec((tm, tk), lambda i, k: (i, k)),   # adj tile (streamed)
        dense_spec,                                     # dense operand
        pl.BlockSpec((1, w_in), lambda i, k: (0, 0)),   # bias row (resident)
    ]
    operands = [adj_bf16, dense_bf16, b_f32]
    if fuse_proj:
        in_specs.append(pl.BlockSpec(w_next.shape, lambda i, k: (0, 0)))
        operands.append(w_next)
        kern = functools.partial(_agg_fused_l1_kernel, tk=tk,
                                 dense_resident=dense_resident)
    else:
        kern = functools.partial(_agg_l2_kernel, tk=tk,
                                 dense_resident=dense_resident)

    return pl.pallas_call(
        kern,
        out_shape=jax.ShapeDtypeStruct((n_pad, w_out), out_dtype),
        grid=(n_pad // tm, n_pad // tk),
        in_specs=in_specs,
        out_specs=pl.BlockSpec((tm, w_out), lambda i, k: (i, 0)),
        scratch_shapes=[pltpu.VMEM((tm, w_in), jnp.float32)],
        compiler_params=pltpu.CompilerParams(
            dimension_semantics=("parallel", "arbitrary"),
            vmem_limit_bytes=budget,
        ),
    )(*operands)


# ------------------------------- wrapper ------------------------------------

def gc_encoder(x, adj, w1, b1, w2, b2):
    """Two-layer GCN forward: relu(adj @ (x@W1) + b1) -> adj @ (.@W2) + b2."""
    n, f_in = x.shape
    nhid = w1.shape[1]
    latent = w2.shape[1]
    budget = _vmem_budget()

    f_pad = _round_up(max(f_in, LANE), LANE)
    h_pad = _round_up(max(nhid, LANE), LANE)
    l_pad = _round_up(max(latent, LANE), LANE)

    n_pad128 = _round_up(max(n, LANE), LANE)
    fast_bytes = (2 * n_pad128 * n_pad128                   # adj (bf16)
                  + 2 * n_pad128 * f_pad                    # x (bf16)
                  + 2 * (f_pad * h_pad + h_pad * l_pad)     # weights (bf16)
                  + 8 * 4 * n_pad128 * max(h_pad, l_pad))   # f32 temporaries
    use_fast = (n_pad128 <= FAST_N_MAX) and (fast_bytes <= budget - (8 << 20))

    # Padded node count: lane multiple for the fast path, 512 multiple for the
    # tiled path so tiles never fall back below 512 (removes the 128-tile cliff).
    n_pad = n_pad128 if use_fast else _round_up(max(n, 512), 512)

    def pad2(a, r, c, dtype):
        return jnp.pad(a.astype(dtype),
                       ((0, r - a.shape[0]), (0, c - a.shape[1])))

    x_p = pad2(x, n_pad, f_pad, jnp.bfloat16)
    adj_p = pad2(adj, n_pad, n_pad, jnp.bfloat16)
    w1_p = pad2(w1, f_pad, h_pad, jnp.bfloat16)
    w2_p = pad2(w2, h_pad, l_pad, jnp.bfloat16)
    b1_p = pad2(b1, 1, h_pad, jnp.float32)
    b2_p = pad2(b2, 1, l_pad, jnp.float32)

    # TODO(synk): F.dropout between layers is identity at inference (training=False).

    if use_fast:
        out_p = _fused_small(x_p, adj_p, w1_p, b1_p, w2_p, b2_p, budget=budget)
    else:
        tm = 512  # small f32 accumulator; >= 2 row blocks (feeds both v7x TCs)
        tk = 2048 if n_pad % 2048 == 0 else (1024 if n_pad % 1024 == 0 else 512)

        # Layer 1 (fused): h1w2 = relu(adj @ (X @ W1) + b1) @ W2
        xw1 = _project(x_p, w1_p, tm=tm, budget=budget)
        h1w2 = _aggregate(adj_p, xw1, b1_p, w2_p, tm=tm, tk=tk, budget=budget,
                          fuse_proj=True, out_dtype=jnp.bfloat16)
        # Layer 2: out = adj @ h1w2 + b2   (act = identity)
        out_p = _aggregate(adj_p, h1w2, b2_p, None, tm=tm, tk=tk, budget=budget,
                           fuse_proj=False, out_dtype=jnp.float32)

    return out_p[:n, :latent]


# ---------------------------- plain-JAX glue ---------------------------------

def normalize_adj(a):
    """A_hat = D^{-1/2} (A + I) D^{-1/2}, as GCNConv does."""
    n = a.shape[0]
    a_hat = a + jnp.eye(n, dtype=a.dtype)
    deg = jnp.sum(a_hat, axis=-1)
    d_inv_sqrt = jnp.where(deg > 0, 1.0 / jnp.sqrt(deg), 0.0)
    return a_hat * d_inv_sqrt[:, None] * d_inv_sqrt[None, :]


def reference_forward(x, adj, w1, b1, w2, b2):
    h1 = jnp.maximum(adj @ (x @ w1) + b1, 0.0)
    return adj @ (h1 @ w2) + b2


if __name__ == "__main__":
    # Small shapes consistent with the module: N nodes, F input features,
    # nhid hidden, latent_dim output.
    N, F_IN, NHID, LATENT = 16, 8, 32, 16

    key = jax.random.PRNGKey(0)
    k_x, k_adj, k_w1, k_w2 = jax.random.split(key, 4)

    # Node features
    x = jax.random.normal(k_x, (N, F_IN), dtype=jnp.float32)

    # Random symmetric binary adjacency -> normalized A_hat
    a_rand = jax.random.uniform(k_adj, (N, N))
    a = (a_rand + a_rand.T > 1.2).astype(jnp.float32)
    a = a * (1.0 - jnp.eye(N, dtype=jnp.float32))
    adj = normalize_adj(a)

    # Deterministic glorot-style parameter init (bias = 0, as in GCNConv reset)
    def glorot(k, shape):
        limit = jnp.sqrt(6.0 / (shape[0] + shape[1]))
        return jax.random.uniform(k, shape, minval=-limit, maxval=limit,
                                  dtype=jnp.float32)

    w1 = glorot(k_w1, (F_IN, NHID))
    b1 = jnp.zeros((1, NHID), dtype=jnp.float32)
    w2 = glorot(k_w2, (NHID, LATENT))
    b2 = jnp.zeros((1, LATENT), dtype=jnp.float32)

    out = gc_encoder(x, adj, w1, b1, w2, b2)
    out = jax.block_until_ready(out)

    ref = reference_forward(x, adj, w1, b1, w2, b2)
    assert out.shape == (N, LATENT), f"bad shape {out.shape}"
    # bf16 MXU inputs with f32 accumulation: loose-but-tight-enough tolerance.
    assert jnp.allclose(out, ref, atol=5e-2, rtol=5e-2), "mismatch vs JAX reference"

    print("KERNEL_OK")
</pallas_src>

<mosaic_0001>
module attributes {stable_mosaic.version = 11 : i64} {
  func.func @_fused_small_kernel(%arg0: memref<128x128xbf16, #tpu.memory_space<vmem>>, %arg1: memref<128x128xbf16, #tpu.memory_space<vmem>>, %arg2: memref<128x128xbf16, #tpu.memory_space<vmem>>, %arg3: memref<1x128xf32, #tpu.memory_space<vmem>>, %arg4: memref<128x128xbf16, #tpu.memory_space<vmem>>, %arg5: memref<1x128xf32, #tpu.memory_space<vmem>>, %arg6: memref<128x128xf32, #tpu.memory_space<vmem>>) attributes {dimension_semantics = [], scalar_prefetch = 0 : i64, scratch_operands = 0 : i64, tpu.core_type = #tpu.core_type<tc>} {
    %c0 = arith.constant 0 : index
    %c0_0 = arith.constant 0 : index
    %0 = vector.load %arg1[%c0, %c0_0] : memref<128x128xbf16, #tpu.memory_space<vmem>>, vector<128x128xbf16>
    %c0_1 = arith.constant 0 : index
    %c0_2 = arith.constant 0 : index
    %1 = vector.load %arg0[%c0_1, %c0_2] : memref<128x128xbf16, #tpu.memory_space<vmem>>, vector<128x128xbf16>
    %c0_3 = arith.constant 0 : index
    %c0_4 = arith.constant 0 : index
    %2 = vector.load %arg2[%c0_3, %c0_4] : memref<128x128xbf16, #tpu.memory_space<vmem>>, vector<128x128xbf16>
    %cst = arith.constant dense<0.000000e+00> : vector<128x128xf32>
    %3 = tpu.matmul %1, %2, %cst {dimension_numbers = #tpu.dot_dimension_numbers<[1], [0], [0], [1], [0, 0, 1, 1], [], []>} : vector<128x128xbf16>, vector<128x128xbf16>, vector<128x128xf32> -> vector<128x128xf32>
    %4 = arith.truncf %3 : vector<128x128xf32> to vector<128x128xbf16>
    %cst_5 = arith.constant dense<0.000000e+00> : vector<128x128xf32>
    %5 = tpu.matmul %0, %4, %cst_5 {dimension_numbers = #tpu.dot_dimension_numbers<[1], [0], [0], [1], [0, 0, 1, 1], [], []>} : vector<128x128xbf16>, vector<128x128xbf16>, vector<128x128xf32> -> vector<128x128xf32>
    %c0_6 = arith.constant 0 : index
    %c0_7 = arith.constant 0 : index
    %6 = vector.load %arg3[%c0_6, %c0_7] : memref<1x128xf32, #tpu.memory_space<vmem>>, vector<1x128xf32>
    %7 = vector.broadcast %6 : vector<1x128xf32> to vector<128x128xf32>
    %8 = arith.addf %5, %7 : vector<128x128xf32>
    %cst_8 = arith.constant 0.000000e+00 : f32
    %9 = vector.broadcast %cst_8 : f32 to vector<128x128xf32>
    %10 = arith.maximumf %8, %9 : vector<128x128xf32>
    %11 = arith.truncf %10 : vector<128x128xf32> to vector<128x128xbf16>
    %c0_9 = arith.constant 0 : index
    %c0_10 = arith.constant 0 : index
    %12 = vector.load %arg4[%c0_9, %c0_10] : memref<128x128xbf16, #tpu.memory_space<vmem>>, vector<128x128xbf16>
    %cst_11 = arith.constant dense<0.000000e+00> : vector<128x128xf32>
    %13 = tpu.matmul %11, %12, %cst_11 {dimension_numbers = #tpu.dot_dimension_numbers<[1], [0], [0], [1], [0, 0, 1, 1], [], []>} : vector<128x128xbf16>, vector<128x128xbf16>, vector<128x128xf32> -> vector<128x128xf32>
    %14 = arith.truncf %13 : vector<128x128xf32> to vector<128x128xbf16>
    %cst_12 = arith.constant dense<0.000000e+00> : vector<128x128xf32>
    %15 = tpu.matmul %0, %14, %cst_12 {dimension_numbers = #tpu.dot_dimension_numbers<[1], [0], [0], [1], [0, 0, 1, 1], [], []>} : vector<128x128xbf16>, vector<128x128xbf16>, vector<128x128xf32> -> vector<128x128xf32>
    %c0_13 = arith.constant 0 : index
    %c0_14 = arith.constant 0 : index
    %16 = vector.load %arg5[%c0_13, %c0_14] : memref<1x128xf32, #tpu.memory_space<vmem>>, vector<1x128xf32>
    %17 = vector.broadcast %16 : vector<1x128xf32> to vector<128x128xf32>
    %18 = arith.addf %15, %17 : vector<128x128xf32>
    %c0_15 = arith.constant 0 : index
    %c0_16 = arith.constant 0 : index
    %19 = vector.load %arg6[%c0_15, %c0_16] : memref<128x128xf32, #tpu.memory_space<vmem>>, vector<128x128xf32>
    tpu.vector_store %arg6[%c0_15, %c0_16], %18 {strides = array<i32>} : memref<128x128xf32, #tpu.memory_space<vmem>>, vector<128x128xf32>,
    return
  }
}

</mosaic_0001>

<bundles_post_ra>
// kernel: tpu_custom_call.1
= control target key start
LH: loop header
LB: loop body
LE: loop exit
PB: predicated region body
PF: predicated region fallthrough
CT: control target
= control target key end

     0   :  { %11 = vsyncpa [#allocation3], 0  ;;  %s1366_s0 = inlined_call_operand.hbm [shape: bf16[128,128], index: 0, kind: input, shape index: {}]   ;;  %s1367_s1 = inlined_call_operand.hbm [shape: bf16[128,128], index: 1, kind: input, shape index: {}]   ;;  %s1368_s2 = inlined_call_operand.hbm [shape: bf16[128,128], index: 2, kind: input, shape index: {}]   ;;  %s1369_s3 = inlined_call_operand.vmem [shape: f32[1,128], index: 3, kind: input, shape index: {}]   ;;  %s1370_s4 = inlined_call_operand.hbm [shape: bf16[128,128], index: 4, kind: input, shape index: {}]   ;;  %s1371_s5 = inlined_call_operand.vmem [shape: f32[1,128], index: 5, kind: input, shape index: {}]   ;;  %s1372_s6 = inlined_call_operand.hbm [shape: f32[128,128], index: 6, kind: output, shape index: {}]  }
   0x1   :  { %12 = vsyncpa [#allocation6], 0 }
   0x2   :  { %13 = vsyncpa [#allocation9], 0 }
   0x3   :  { %14 = vsyncpa [#allocation4], 0  ;;  %s1198_s21 = smov [#allocation5]   ;;  %s1199_s23 = smov [#allocation2]  }
   0x4   :  { %s32_s22 = sshll.u32 %s1198_s21, 4  ;;  %s20_s24 = sshll.u32 %s1199_s23, 4  ;;  %s33_s22 = int_to_ptr.vmem [resolvable:$true] %s32_s22  ;;  %s1242_s24 = int_to_ptr.vmem [resolvable:$true] %s20_s24 }
   0x5   :  { %s1080_s27 = scalar_lea.hbm %s1367_s1, 1024 }
   0x6   :  { %p1081_p0 = scmp.ne.s32.totalorder %s1367_s1, %s1080_s27  ;;  %p1084_p1 = scmp.lt.u32.totalorder %s1080_s27, %s1367_s1 }
   0x8   :  { %p1086_p2 = pnand %p1084_p1, %p1081_p0 }
   0xa   :  { %1089 = shalt.err (!%p1086_p2)
}
   0xb   :  { %s1090_s8 = scalar_lea.vmem %s33_s22, 1024  ;;  %p1095_p4 = scmp.lt.s32.totalorder %s33_s22, %s33_s22 }
   0xc   :  { %p1091_p3 = scmp.ne.s32.totalorder %s33_s22, %s1090_s8  ;;  %p1096_p5 = scmp.lt.s32.totalorder %s1090_s8, %s1090_s8 }
   0xe   :  { %p1097_p6 = por %p1096_p5, %p1095_p4 }
  0x10   :  { %p1098_p7 = pnand %p1097_p6, %p1091_p3 }
  0x12   :  { %1101 = shalt.err (!%p1098_p7)
}
  0x13   :  { %s1200_s9 = smov 64   ;;  %s1201_s10 = smov 4  }
  0x14   :  { %38 = dma.hbm_to_vmem [thread:$0]  %s1367_s1, 1024, %s33_s22, [#allocation6], %s1200_s9, %s1200_s9, %s1201_s10  }
  0x15   :  { %s1102_s15 = scalar_lea.hbm %s1366_s0, 1024 }
  0x16   :  { %p1103_p8 = scmp.ne.s32.totalorder %s1366_s0, %s1102_s15  ;;  %p1106_p9 = scmp.lt.u32.totalorder %s1102_s15, %s1366_s0 }
  0x18   :  { %p1108_p10 = pnand %p1106_p9, %p1103_p8 }
  0x1a   :  { %1111 = shalt.err (!%p1108_p10)
}
  0x1b   :  { %s1112_s20 = scalar_lea.vmem %s1242_s24, 1024  ;;  %p1117_p12 = scmp.lt.s32.totalorder %s1242_s24, %s1242_s24 }
  0x1c   :  { %p1113_p11 = scmp.ne.s32.totalorder %s1242_s24, %s1112_s20  ;;  %p1118_p13 = scmp.lt.s32.totalorder %s1112_s20, %s1112_s20 }
  0x1e   :  { %p1119_p0 = por %p1118_p13, %p1117_p12 }
  0x20   :  { %p1120_p1 = pnand %p1119_p0, %p1113_p11 }
  0x22   :  { %1123 = shalt.err (!%p1120_p1)
}
  0x23   :  { %26 = dma.hbm_to_vmem [thread:$0]  %s1366_s0, 1024, %s1242_s24, [#allocation3], %s1200_s9, %s1200_s9, %s1201_s10  }
  0x24   :  { %s1202_s22 = smov [#allocation7]   ;;  %s1203_s25 = smov [#allocation8]  }
  0x25   :  { %s44_s23 = sshll.u32 %s1202_s22, 4  ;;  %s58_s26 = sshll.u32 %s1203_s25, 4  ;;  %s45_s23 = int_to_ptr.vmem [resolvable:$true] %s44_s23  ;;  %s1279_s26 = int_to_ptr.vmem [resolvable:$true] %s58_s26 }
  0x26   :  { %s1124_s29 = scalar_lea.hbm %s1368_s2, 1024 }
  0x27   :  { %p1125_p2 = scmp.ne.s32.totalorder %s1368_s2, %s1124_s29  ;;  %p1128_p3 = scmp.lt.u32.totalorder %s1124_s29, %s1368_s2 }
  0x29   :  { %p1130_p4 = pnand %p1128_p3, %p1125_p2 }
  0x2b   :  { %1133 = shalt.err (!%p1130_p4)
}
  0x2c   :  { %s1134_s0 = scalar_lea.vmem %s45_s23, 1024  ;;  %p1139_p6 = scmp.lt.s32.totalorder %s45_s23, %s45_s23 }
  0x2d   :  { %p1135_p5 = scmp.ne.s32.totalorder %s45_s23, %s1134_s0  ;;  %p1140_p7 = scmp.lt.s32.totalorder %s1134_s0, %s1134_s0 }
  0x2f   :  { %p1141_p8 = por %p1140_p7, %p1139_p6 }
  0x31   :  { %p1142_p9 = pnand %p1141_p8, %p1135_p5 }
  0x33   :  { %1145 = shalt.err (!%p1142_p9)
}
  0x34   :  { %50 = dma.hbm_to_vmem [thread:$0]  %s1368_s2, 1024, %s45_s23, [#allocation6], %s1200_s9, %s1200_s9, %s1201_s10  }
  0x35   :  { %s1146_s15 = scalar_lea.hbm %s1370_s4, 1024 }
  0x36   :  { %p1147_p10 = scmp.ne.s32.totalorder %s1370_s4, %s1146_s15  ;;  %p1150_p11 = scmp.lt.u32.totalorder %s1146_s15, %s1370_s4 }
  0x38   :  { %p1152_p12 = pnand %p1150_p11, %p1147_p10 }
  0x3a   :  { %1155 = shalt.err (!%p1152_p12)
}
  0x3b   :  { %s1156_s20 = scalar_lea.vmem %s1279_s26, 1024  ;;  %p1161_p0 = scmp.lt.s32.totalorder %s1279_s26, %s1279_s26 }
  0x3c   :  { %p1157_p13 = scmp.ne.s32.totalorder %s1279_s26, %s1156_s20  ;;  %p1162_p1 = scmp.lt.s32.totalorder %s1156_s20, %s1156_s20 }
  0x3e   :  { %p1163_p2 = por %p1162_p1, %p1161_p0 }
  0x40   :  { %p1164_p3 = pnand %p1163_p2, %p1157_p13 }
  0x42   :  { %1167 = shalt.err (!%p1164_p3)
}
  0x43   :  { %64 = dma.hbm_to_vmem [thread:$0]  %s1370_s4, 1024, %s1279_s26, [#allocation9], %s1200_s9, %s1200_s9, %s1201_s10  }
  0x44   :  { %1190 = dma.done.wait [#allocation3], 1024  }
  0x45   :  { %1191 = vsyncadd [#allocation3], 4294966272 }
  0x46   :  { %1192 = dma.done.wait [#allocation6], 2048  }
  0x47   :  { %1193 = vsyncadd [#allocation6], 4294965248 }
  0x48   :  { %1194 = dma.done.wait [#allocation9], 1024  }
  0x49   :  { %1195 = vsyncadd [#allocation9], 4294966272  ;;  %v1048_v0 = vld [vmem:[#allocation7] sm:$0xff]   ;;  %v1049_v1 = vld [vmem:[#allocation7 + $0x8] sm:$0xff]  }
  0x4a   :  { %911 = vmatprep.subr.bf16.mxu0 %v1048_v0  ;;  %v1050_v2 = vld [vmem:[#allocation7 + $0x10] sm:$0xff]   ;;  %v1051_v3 = vld [vmem:[#allocation7 + $0x18] sm:$0xff]   ;;  %v1056_v4 = vld [vmem:[#allocation2] sm:$0xff]  }
  0x4b   :  { %912 = vmatpush3.bf16.msra.mxu0 %v1048_v0  ;;  %927 = vmatprep.mubr.bf16.mxu0 %v1056_v4  ;;  %v1052_v5 = vld [vmem:[#allocation7 + $0x20] sm:$0xff]   ;;  %v1053_v6 = vld [vmem:[#allocation7 + $0x28] sm:$0xff]   ;;  %v1054_v7 = vld [vmem:[#allocation7 + $0x30] sm:$0xff]  }
  0x4c   :  { %913 = vmatprep.subr.bf16.mxu0 %v1049_v1  ;;  %v1055_v8 = vld [vmem:[#allocation7 + $0x38] sm:$0xff]   ;;  %v1057_v9 = vld [vmem:[#allocation2 + $0x8] sm:$0xff]   ;;  %v1058_v10 = vld [vmem:[#allocation2 + $0x10] sm:$0xff]  }
  0x4d   :  { %v1059_v11 = vld [vmem:[#allocation2 + $0x18] sm:$0xff]   ;;  %v1060_v12 = vld [vmem:[#allocation2 + $0x20] sm:$0xff]   ;;  %v1061_v13 = vld [vmem:[#allocation2 + $0x28] sm:$0xff]  }
  0x4e   :  { %v1062_v14 = vld [vmem:[#allocation2 + $0x30] sm:$0xff]   ;;  %v1063_v15 = vld [vmem:[#allocation2 + $0x38] sm:$0xff]   ;;  %v1316_v16 = vld [vmem:[#allocation5] sm:$0xff]  }
  0x4f   :  { %914 = vmatpush3.bf16.msra.mxu0 %v1049_v1  ;;  %959 = vmatprep.mubr.bf16.mxu1 %v1316_v16  ;;  %v1072_v17 = vld [vmem:[#allocation8] sm:$0xff]   ;;  %v1073_v18 = vld [vmem:[#allocation8 + $0x8] sm:$0xff]   ;;  %v1074_v19 = vld [vmem:[#allocation8 + $0x10] sm:$0xff]  }
  0x50   :  { %915 = vmatprep.subr.bf16.mxu0 %v1050_v2  ;;  %v1075_v20 = vld [vmem:[#allocation8 + $0x18] sm:$0xff]   ;;  %v1076_v21 = vld [vmem:[#allocation8 + $0x20] sm:$0xff]   ;;  %v1077_v22 = vld [vmem:[#allocation8 + $0x28] sm:$0xff]  }
  0x51   :  { %v1319_v47 = vld [vmem:[#allocation5 + $0x8] sm:$0xff]   ;;  %v1321_v48 = vld [vmem:[#allocation5 + $0x10] sm:$0xff]   ;;  %v1325_v49 = vld [vmem:[#allocation5 + $0x18] sm:$0xff]  }
  0x52   :  { %v1327_v50 = vld [vmem:[#allocation5 + $0x20] sm:$0xff]   ;;  %v1331_v51 = vld [vmem:[#allocation5 + $0x28] sm:$0xff]   ;;  %v1333_v52 = vld [vmem:[#allocation5 + $0x30] sm:$0xff]  }
  0x53   :  { %916 = vmatpush3.bf16.msra.mxu0 %v1050_v2  ;;  %v1337_v53 = vld [vmem:[#allocation5 + $0x38] sm:$0xff]   ;;  %v1078_v54 = vld [vmem:[#allocation8 + $0x30] sm:$0xff]   ;;  %v829_v56 = vld [vmem:[%s1369_s3] ss:$0 sm:$0xff] }
  0x54   :  { %917 = vmatprep.subr.bf16.mxu0 %v1051_v3  ;;  %v1079_v55 = vld [vmem:[#allocation8 + $0x38] sm:$0xff]  }
  0x57   :  { %918 = vmatpush3.bf16.msra.mxu0 %v1051_v3 }
  0x58   :  { %919 = vmatprep.subr.bf16.mxu0 %v1052_v5 }
  0x5b   :  { %920 = vmatpush3.bf16.msra.mxu0 %v1052_v5 }
  0x5c   :  { %921 = vmatprep.subr.bf16.mxu0 %v1053_v6 }
  0x5f   :  { %922 = vmatpush3.bf16.msra.mxu0 %v1053_v6 }
  0x60   :  { %923 = vmatprep.subr.bf16.mxu0 %v1054_v7 }
  0x63   :  { %924 = vmatpush3.bf16.msra.mxu0 %v1054_v7 }
  0x64   :  { %925 = vmatprep.subr.bf16.mxu0 %v1055_v8 }
  0x67   :  { %926 = vmatpush3.bf16.msra.mxu0 %v1055_v8 }
  0x68   :  { %975 = vmatprep.subr.bf16.mxu0 %v1072_v17 }
  0x6a   :  { %928 = vmatmul.mubr.bf16.vlgmr.msra.gmra.mrb[0].mxu0 %v1057_v9 }
  0x6b   :  { %931 = vmatprep.mubr.bf16.mxu0 %v1058_v10  ;;  %976 = vmatpush3.bf16.msra.mxu0 %v1072_v17 }
  0x6c   :  { %977 = vmatprep.subr.bf16.mxu0 %v1073_v18 }
  0x6f   :  { %978 = vmatpush3.bf16.msra.mxu0 %v1073_v18 }
  0x70   :  { %979 = vmatprep.subr.bf16.mxu0 %v1074_v19 }
  0x72   :  { %932 = vmatmul.mubr.bf16.gmra.mrb[4].mxu0 %v1059_v11 }
  0x73   :  { %935 = vmatprep.mubr.bf16.mxu0 %v1060_v12  ;;  %980 = vmatpush3.bf16.msra.mxu0 %v1074_v19 }
  0x74   :  { %981 = vmatprep.subr.bf16.mxu0 %v1075_v20 }
  0x77   :  { %982 = vmatpush3.bf16.msra.mxu0 %v1075_v20 }
  0x78   :  { %983 = vmatprep.subr.bf16.mxu0 %v1076_v21 }
  0x7a   :  { %936 = vmatmul.mubr.bf16.gmra.mrb[8].mxu0 %v1061_v13 }
  0x7b   :  { %939 = vmatprep.mubr.bf16.mxu0 %v1062_v14  ;;  %984 = vmatpush3.bf16.msra.mxu0 %v1076_v21 }
  0x7c   :  { %985 = vmatprep.subr.bf16.mxu0 %v1077_v22 }
  0x7f   :  { %986 = vmatpush3.bf16.msra.mxu0 %v1077_v22 }
  0x80   :  { %987 = vmatprep.subr.bf16.mxu0 %v1078_v54 }
  0x82   :  { %940 = vmatmul.mubr.bf16.gmra.mrb[12].mxu0 %v1063_v15 }
  0x83   :  { %988 = vmatpush3.bf16.msra.mxu0 %v1078_v54 }
  0x84   :  { %989 = vmatprep.subr.bf16.mxu0 %v1079_v55 }
  0x87   :  { %990 = vmatpush3.bf16.msra.mxu0 %v1079_v55 }
 0x13d   :  { %v929_v23 = vpop.f32.mrb[0].mxu0 }
 0x13e   :  { %v258_v24 = vpop.f32.mrb[1].mxu0 }
 0x13f   :  { %v930_v25 = vpop.f32.mrb[2].mxu0 }
 0x140   :  { %v322_v26 = vpack.c.bf16 %v930_v25, %v929_v23  ;;  %v261_v27 = vpop.f32.mrb[3].mxu0 }
 0x141   :  { %v321_v28 = vpack.c.bf16 %v261_v27, %v258_v24 }
 0x143   :  { %943 = vmatprep.subr.bf16.mxu1 %v321_v28 }
 0x144   :  { %944 = vmatpush3.bf16.msra.mxu1 %v321_v28 }
 0x145   :  { %v933_v29 = vpop.f32.mrb[4].mxu0  ;;  %945 = vmatprep.subr.bf16.mxu1 %v322_v26 }
 0x146   :  { %v274_v30 = vpop.f32.mrb[5].mxu0 }
 0x147   :  { %v934_v31 = vpop.f32.mrb[6].mxu0 }
 0x148   :  { %v324_v32 = vpack.c.bf16 %v934_v31, %v933_v29  ;;  %v277_v33 = vpop.f32.mrb[7].mxu0  ;;  %946 = vmatpush3.bf16.msra.mxu1 %v322_v26 }
 0x149   :  { %v323_v34 = vpack.c.bf16 %v277_v33, %v274_v30 }
 0x14b   :  { %947 = vmatprep.subr.bf16.mxu1 %v323_v34 }
 0x14c   :  { %948 = vmatpush3.bf16.msra.mxu1 %v323_v34 }
 0x14d   :  { %v937_v35 = vpop.f32.mrb[8].mxu0  ;;  %949 = vmatprep.subr.bf16.mxu1 %v324_v32 }
 0x14e   :  { %v290_v36 = vpop.f32.mrb[9].mxu0 }
 0x14f   :  { %v938_v37 = vpop.f32.mrb[10].mxu0 }
 0x150   :  { %v326_v38 = vpack.c.bf16 %v938_v37, %v937_v35  ;;  %v293_v39 = vpop.f32.mrb[11].mxu0  ;;  %950 = vmatpush3.bf16.msra.mxu1 %v324_v32 }
 0x151   :  { %v325_v40 = vpack.c.bf16 %v293_v39, %v290_v36 }
 0x153   :  { %951 = vmatprep.subr.bf16.mxu1 %v325_v40 }
 0x154   :  { %952 = vmatpush3.bf16.msra.mxu1 %v325_v40 }
 0x155   :  { %v941_v41 = vpop.f32.mrb[12].mxu0  ;;  %953 = vmatprep.subr.bf16.mxu1 %v326_v38 }
 0x156   :  { %v306_v42 = vpop.f32.mrb[13].mxu0 }
 0x157   :  { %v942_v43 = vpop.f32.mrb[14].mxu0 }
 0x158   :  { %v328_v44 = vpack.c.bf16 %v942_v43, %v941_v41  ;;  %v309_v45 = vpop.f32.mrb[15].mxu0  ;;  %954 = vmatpush3.bf16.msra.mxu1 %v326_v38 }
 0x159   :  { %v327_v46 = vpack.c.bf16 %v309_v45, %v306_v42 }
 0x15b   :  { %955 = vmatprep.subr.bf16.mxu1 %v327_v46 }
 0x15c   :  { %956 = vmatpush3.bf16.msra.mxu1 %v327_v46 }
 0x15d   :  { %957 = vmatprep.subr.bf16.mxu1 %v328_v44 }
 0x160   :  { %958 = vmatpush3.bf16.msra.mxu1 %v328_v44 }
 0x163   :  { %960 = vmatmul.mubr.bf16.vlgmr.msra.gmra.mrb[0].mxu1 %v1319_v47 }
 0x164   :  { %963 = vmatprep.mubr.bf16.mxu1 %v1321_v48 }
 0x16b   :  { %964 = vmatmul.mubr.bf16.gmra.mrb[4].mxu1 %v1325_v49 }
 0x16c   :  { %967 = vmatprep.mubr.bf16.mxu1 %v1327_v50 }
 0x173   :  { %968 = vmatmul.mubr.bf16.gmra.mrb[8].mxu1 %v1331_v51 }
 0x174   :  { %971 = vmatprep.mubr.bf16.mxu1 %v1333_v52 }
 0x17b   :  { %972 = vmatmul.mubr.bf16.gmra.mrb[12].mxu1 %v1337_v53 }
 0x17c   :  { %1023 = vmatprep.mubr.bf16.mxu1 %v1316_v16 }
 0x236   :  { %v961_v57 = vpop.f32.mrb[0].mxu1 }
 0x237   :  { %v427_v58 = vadd.f32 %v961_v57, %v829_v56  ;;  %v418_v59 = vpop.f32.mrb[1].mxu1 }
 0x238   :  { %v419_v60 = vadd.f32 %v829_v56, %v418_v59  ;;  %v962_v61 = vpop.f32.mrb[2].mxu1 }
 0x239   :  { %v430_v62 = vadd.f32 %v962_v61, %v829_v56  ;;  %v421_v63 = vpop.f32.mrb[3].mxu1  ;;  %v483_v1 = vmax.f32 %v427_v58, 0.0 }
 0x23a   :  { %v422_v0 = vadd.f32 %v829_v56, %v421_v63  ;;  %v481_v3 = vmax.f32 %v419_v60, 0.0 }
 0x23b   :  { %v484_v2 = vmax.f32 %v430_v62, 0.0 }
 0x23c   :  { %v482_v4 = vmax.f32 %v422_v0, 0.0 }
 0x23d   :  { %v498_v5 = vpack.c.bf16 %v484_v2, %v483_v1 }
 0x23e   :  { %v497_v6 = vpack.c.bf16 %v482_v4, %v481_v3  ;;  %v965_v7 = vpop.f32.mrb[4].mxu1 }
 0x23f   :  { %v443_v8 = vadd.f32 %v965_v7, %v829_v56  ;;  %v434_v9 = vpop.f32.mrb[5].mxu1 }
 0x240   :  { %v435_v10 = vadd.f32 %v829_v56, %v434_v9  ;;  %v966_v11 = vpop.f32.mrb[6].mxu1  ;;  %991 = vmatprep.mubr.bf16.mxu0 %v497_v6 }
 0x241   :  { %v446_v12 = vadd.f32 %v966_v11, %v829_v56  ;;  %v437_v13 = vpop.f32.mrb[7].mxu1  ;;  %992 = vmatmul.mubr.bf16.vlgmr.msra.gmra.mrb[16].mxu0 %v498_v5  ;;  %v487_v15 = vmax.f32 %v443_v8, 0.0 }
 0x242   :  { %v438_v14 = vadd.f32 %v829_v56, %v437_v13  ;;  %v485_v17 = vmax.f32 %v435_v10, 0.0 }
 0x243   :  { %v488_v16 = vmax.f32 %v446_v12, 0.0 }
 0x244   :  { %v486_v18 = vmax.f32 %v438_v14, 0.0 }
 0x245   :  { %v500_v19 = vpack.c.bf16 %v488_v16, %v487_v15  ;;  %v846_v16 = vld [vmem:[%s1371_s5] ss:$0 sm:$0xff]  ;;  %s1204_s5 = smov [#allocation10]  }
 0x246   :  { %v499_v20 = vpack.c.bf16 %v486_v18, %v485_v17  ;;  %v969_v21 = vpop.f32.mrb[8].mxu1  ;;  %s799_s21 = sshll.u32 %s1204_s5, 4  ;;  %s800_s21 = int_to_ptr.vmem [resolvable:$true] %s799_s21 }
 0x247   :  { %v459_v22 = vadd.f32 %v969_v21, %v829_v56  ;;  %v450_v23 = vpop.f32.mrb[9].mxu1  ;;  %s1168_s22 = scalar_lea.vmem %s800_s21, 2048  ;;  %p1173_p5 = scmp.lt.s32.totalorder %s800_s21, %s800_s21 }
 0x248   :  { %v451_v24 = vadd.f32 %v829_v56, %v450_v23  ;;  %v970_v25 = vpop.f32.mrb[10].mxu1  ;;  %995 = vmatprep.mubr.bf16.mxu0 %v499_v20  ;;  %p1169_p4 = scmp.ne.s32.totalorder %s800_s21, %s1168_s22  ;;  %p1174_p6 = scmp.lt.s32.totalorder %s1168_s22, %s1168_s22 }
 0x249   :  { %v462_v26 = vadd.f32 %v970_v25, %v829_v56  ;;  %v453_v27 = vpop.f32.mrb[11].mxu1  ;;  %996 = vmatmul.mubr.bf16.gmra.mrb[20].mxu0 %v500_v19  ;;  %v491_v29 = vmax.f32 %v459_v22, 0.0 }
 0x24a   :  { %v454_v28 = vadd.f32 %v829_v56, %v453_v27  ;;  %v489_v31 = vmax.f32 %v451_v24, 0.0  ;;  %p1175_p7 = por %p1174_p6, %p1173_p5 }
 0x24b   :  { %v492_v30 = vmax.f32 %v462_v26, 0.0 }
 0x24c   :  { %v490_v32 = vmax.f32 %v454_v28, 0.0  ;;  %p1176_p8 = pnand %p1175_p7, %p1169_p4 }
 0x24d   :  { %v502_v33 = vpack.c.bf16 %v492_v30, %v491_v29 }
 0x24e   :  { %v501_v34 = vpack.c.bf16 %v490_v32, %v489_v31  ;;  %v973_v35 = vpop.f32.mrb[12].mxu1 }
 0x24f   :  { %v475_v36 = vadd.f32 %v973_v35, %v829_v56  ;;  %v466_v37 = vpop.f32.mrb[13].mxu1 }
 0x250   :  { %v467_v38 = vadd.f32 %v829_v56, %v466_v37  ;;  %v974_v39 = vpop.f32.mrb[14].mxu1  ;;  %999 = vmatprep.mubr.bf16.mxu0 %v501_v34 }
 0x251   :  { %v478_v40 = vadd.f32 %v974_v39, %v829_v56  ;;  %v469_v41 = vpop.f32.mrb[15].mxu1  ;;  %1000 = vmatmul.mubr.bf16.gmra.mrb[24].mxu0 %v502_v33  ;;  %v495_v43 = vmax.f32 %v475_v36, 0.0 }
 0x252   :  { %v470_v42 = vadd.f32 %v829_v56, %v469_v41  ;;  %v493_v45 = vmax.f32 %v467_v38, 0.0 }
 0x253   :  { %v496_v44 = vmax.f32 %v478_v40, 0.0 }
 0x254   :  { %v494_v46 = vmax.f32 %v470_v42, 0.0 }
 0x255   :  { %v504_v54 = vpack.c.bf16 %v496_v44, %v495_v43 }
 0x256   :  { %v503_v55 = vpack.c.bf16 %v494_v46, %v493_v45 }
 0x258   :  { %1003 = vmatprep.mubr.bf16.mxu0 %v503_v55 }
 0x259   :  { %1004 = vmatmul.mubr.bf16.gmra.mrb[28].mxu0 %v504_v54 }
 0x314   :  { %v993_v57 = vpop.f32.mrb[16].mxu0 }
 0x315   :  { %v603_v58 = vpop.f32.mrb[17].mxu0 }
 0x316   :  { %v994_v59 = vpop.f32.mrb[18].mxu0 }
 0x317   :  { %v667_v60 = vpack.c.bf16 %v994_v59, %v993_v57  ;;  %v606_v61 = vpop.f32.mrb[19].mxu0 }
 0x318   :  { %v666_v62 = vpack.c.bf16 %v606_v61, %v603_v58 }
 0x31a   :  { %1007 = vmatprep.subr.bf16.mxu1 %v666_v62 }
 0x31b   :  { %1008 = vmatpush3.bf16.msra.mxu1 %v666_v62 }
 0x31c   :  { %v997_v63 = vpop.f32.mrb[20].mxu0  ;;  %1009 = vmatprep.subr.bf16.mxu1 %v667_v60 }
 0x31d   :  { %v619_v0 = vpop.f32.mrb[21].mxu0 }
 0x31e   :  { %v998_v56 = vpop.f32.mrb[22].mxu0 }
 0x31f   :  { %v669_v1 = vpack.c.bf16 %v998_v56, %v997_v63  ;;  %v622_v2 = vpop.f32.mrb[23].mxu0  ;;  %1010 = vmatpush3.bf16.msra.mxu1 %v667_v60 }
 0x320   :  { %v668_v3 = vpack.c.bf16 %v622_v2, %v619_v0 }
 0x322   :  { %1011 = vmatprep.subr.bf16.mxu1 %v668_v3 }
 0x323   :  { %1012 = vmatpush3.bf16.msra.mxu1 %v668_v3 }
 0x324   :  { %v1001_v4 = vpop.f32.mrb[24].mxu0  ;;  %1013 = vmatprep.subr.bf16.mxu1 %v669_v1 }
 0x325   :  { %v635_v5 = vpop.f32.mrb[25].mxu0 }
 0x326   :  { %v1002_v6 = vpop.f32.mrb[26].mxu0 }
 0x327   :  { %v671_v7 = vpack.c.bf16 %v1002_v6, %v1001_v4  ;;  %v638_v8 = vpop.f32.mrb[27].mxu0  ;;  %1014 = vmatpush3.bf16.msra.mxu1 %v669_v1 }
 0x328   :  { %v670_v9 = vpack.c.bf16 %v638_v8, %v635_v5 }
 0x32a   :  { %1015 = vmatprep.subr.bf16.mxu1 %v670_v9 }
 0x32b   :  { %1016 = vmatpush3.bf16.msra.mxu1 %v670_v9 }
 0x32c   :  { %v1005_v10 = vpop.f32.mrb[28].mxu0  ;;  %1017 = vmatprep.subr.bf16.mxu1 %v671_v7 }
 0x32d   :  { %v651_v11 = vpop.f32.mrb[29].mxu0 }
 0x32e   :  { %v1006_v12 = vpop.f32.mrb[30].mxu0 }
 0x32f   :  { %v673_v13 = vpack.c.bf16 %v1006_v12, %v1005_v10  ;;  %v654_v14 = vpop.f32.mrb[31].mxu0  ;;  %1018 = vmatpush3.bf16.msra.mxu1 %v671_v7 }
 0x330   :  { %v672_v15 = vpack.c.bf16 %v654_v14, %v651_v11 }
 0x332   :  { %1019 = vmatprep.subr.bf16.mxu1 %v672_v15 }
 0x333   :  { %1020 = vmatpush3.bf16.msra.mxu1 %v672_v15 }
 0x334   :  { %1021 = vmatprep.subr.bf16.mxu1 %v673_v13 }
 0x337   :  { %1022 = vmatpush3.bf16.msra.mxu1 %v673_v13 }
 0x33a   :  { %1024 = vmatmul.mubr.bf16.vlgmr.msra.gmra.mrb[16].mxu1 %v1319_v47 }
 0x33b   :  { %1027 = vmatprep.mubr.bf16.mxu1 %v1321_v48 }
 0x342   :  { %1028 = vmatmul.mubr.bf16.gmra.mrb[20].mxu1 %v1325_v49 }
 0x343   :  { %1031 = vmatprep.mubr.bf16.mxu1 %v1327_v50 }
 0x34a   :  { %1032 = vmatmul.mubr.bf16.gmra.mrb[24].mxu1 %v1331_v51 }
 0x34b   :  { %1035 = vmatprep.mubr.bf16.mxu1 %v1333_v52 }
 0x352   :  { %1036 = vmatmul.mubr.bf16.gmra.mrb[28].mxu1 %v1337_v53 }
 0x40d   :  { %v1025_v17 = vpop.f32.mrb[16].mxu1 }
 0x40e   :  { %v724_v18 = vadd.f32 %v1025_v17, %v846_v16  ;;  %v715_v19 = vpop.f32.mrb[17].mxu1 }
 0x40f   :  { %v716_v47 = vadd.f32 %v846_v16, %v715_v19  ;;  %v1026_v20 = vpop.f32.mrb[18].mxu1 }
 0x410   :  { %780 = vst [vmem:[#allocation10 + $0x10] sm:$0xff] %v724_v18  ;;  %v727_v48 = vadd.f32 %v1026_v20, %v846_v16  ;;  %v718_v49 = vpop.f32.mrb[19].mxu1 }
 0x411   :  { %778 = vst [vmem:[#allocation10] sm:$0xff] %v716_v47  ;;  %v719_v50 = vadd.f32 %v846_v16, %v718_v49 }
 0x412   :  { %781 = vst [vmem:[#allocation10 + $0x18] sm:$0xff] %v727_v48 }
 0x413   :  { %779 = vst [vmem:[#allocation10 + $0x8] sm:$0xff] %v719_v50 }
 0x415   :  { %v1029_v51 = vpop.f32.mrb[20].mxu1 }
 0x416   :  { %v740_v52 = vadd.f32 %v1029_v51, %v846_v16  ;;  %v731_v21 = vpop.f32.mrb[21].mxu1 }
 0x417   :  { %v732_v53 = vadd.f32 %v846_v16, %v731_v21  ;;  %v1030_v22 = vpop.f32.mrb[22].mxu1 }
 0x418   :  { %784 = vst [vmem:[#allocation10 + $0x30] sm:$0xff] %v740_v52  ;;  %v743_v23 = vadd.f32 %v1030_v22, %v846_v16  ;;  %v734_v24 = vpop.f32.mrb[23].mxu1 }
 0x419   :  { %782 = vst [vmem:[#allocation10 + $0x20] sm:$0xff] %v732_v53  ;;  %v735_v25 = vadd.f32 %v846_v16, %v734_v24 }
 0x41a   :  { %785 = vst [vmem:[#allocation10 + $0x38] sm:$0xff] %v743_v23 }
 0x41b   :  { %783 = vst [vmem:[#allocation10 + $0x28] sm:$0xff] %v735_v25 }
 0x41d   :  { %v1033_v26 = vpop.f32.mrb[24].mxu1 }
 0x41e   :  { %v756_v27 = vadd.f32 %v1033_v26, %v846_v16  ;;  %v747_v28 = vpop.f32.mrb[25].mxu1 }
 0x41f   :  { %v748_v29 = vadd.f32 %v846_v16, %v747_v28  ;;  %v1034_v30 = vpop.f32.mrb[26].mxu1 }
 0x420   :  { %788 = vst [vmem:[#allocation10 + $0x50] sm:$0xff] %v756_v27  ;;  %v759_v31 = vadd.f32 %v1034_v30, %v846_v16  ;;  %v750_v32 = vpop.f32.mrb[27].mxu1 }
 0x421   :  { %786 = vst [vmem:[#allocation10 + $0x40] sm:$0xff] %v748_v29  ;;  %v751_v33 = vadd.f32 %v846_v16, %v750_v32 }
 0x422   :  { %789 = vst [vmem:[#allocation10 + $0x58] sm:$0xff] %v759_v31 }
 0x423   :  { %787 = vst [vmem:[#allocation10 + $0x48] sm:$0xff] %v751_v33 }
 0x425   :  { %v1037_v34 = vpop.f32.mrb[28].mxu1 }
 0x426   :  { %v772_v35 = vadd.f32 %v1037_v34, %v846_v16  ;;  %v763_v36 = vpop.f32.mrb[29].mxu1 }
 0x427   :  { %v764_v37 = vadd.f32 %v846_v16, %v763_v36  ;;  %v1038_v38 = vpop.f32.mrb[30].mxu1 }
 0x428   :  { %792 = vst [vmem:[#allocation10 + $0x70] sm:$0xff] %v772_v35  ;;  %v775_v39 = vadd.f32 %v1038_v38, %v846_v16  ;;  %v766_v40 = vpop.f32.mrb[31].mxu1 }
 0x429   :  { %790 = vst [vmem:[#allocation10 + $0x60] sm:$0xff] %v764_v37  ;;  %v767_v41 = vadd.f32 %v846_v16, %v766_v40 }
 0x42a   :  { %793 = vst [vmem:[#allocation10 + $0x78] sm:$0xff] %v775_v39 }
 0x42b   :  { %791 = vst [vmem:[#allocation10 + $0x68] sm:$0xff] %v767_v41 }
 0x42c   :  { %1179 = shalt.err (!%p1176_p8)
}
 0x42d   :  { %s1180_s26 = scalar_lea.hbm %s1372_s6, 2048 }
 0x42e   :  { %p1181_p9 = scmp.ne.s32.totalorder %s1372_s6, %s1180_s26  ;;  %p1184_p10 = scmp.lt.u32.totalorder %s1180_s26, %s1372_s6 }
 0x430   :  { %p1186_p11 = pnand %p1184_p10, %p1181_p9 }
 0x432   :  { %1189 = shalt.err (!%p1186_p11)
}
 0x433   :  { %s1205_s7 = smov 128   ;;  %s1206_s8 = smov 8  }
 0x434   :  { %805 = dma.vmem_to_hbm [thread:$0]  %s800_s21, 2048, %s1372_s6, [#allocation4], %s1205_s7, %s1205_s7, %s1206_s8  }
 0x435   :  { %1196 = dma.done.wait [#allocation4], 2048  }
 0x436   :  { %1197 = vsyncadd [#allocation4], 4294965248 }
 0x437   :  { %809 = vsyncpa [#allocation3], 1 }
 0x438   :  { %810 = vsyncpa [#allocation6], 1 }
 0x439   :  { %811 = vsyncpa [#allocation9], 1 }
 0x43a   :  { %812 = vsyncpa [#allocation4], 1 }

</bundles_post_ra>
